<compile_context>
chip_gen: v5e
topology: v5e:2x2
jax: 0.10.0
libtpu: 0.0.40
codegen_flags: <defaults>
</compile_context>

<pallas_src>
import math
import functools

import jax
import jax.numpy as jnp
from jax import lax
from jax.experimental import pallas as pl
from jax.experimental.pallas import tpu as pltpu


# ----------------------------------------------------------------------------
# Fused kernel: single invocation, batch & heads unrolled at trace time.
# ----------------------------------------------------------------------------

def _fused_attention_kernel(x_ref, wqkv_ref, wo_ref, cos_ref, sin_ref, o_ref,
                            *, n_heads, n_kv_heads, head_dim):
    B, S, D = x_ref.shape
    n_rep = n_heads // n_kv_heads
    dh2 = head_dim // 2
    qre_w = n_heads * dh2                       # width of the q "real" block
    re_w = (n_heads + n_kv_heads) * dh2         # width of the q|k "real" block
    ngroups = n_heads + n_kv_heads

    # Grid-invariant operands: load once, reuse for every batch element.
    wqkv = wqkv_ref[...]                        # (D, 2*re_w + Hkv*Dh)  bf16
    wo = wo_ref[...]                            # (Hq*Dh, D)            bf16

    # RoPE tables: tiny (S, Dh/2) tables tiled across the q|k head groups once
    # (hoisted out of the batch loop -- JAX does not CSE broadcasts).
    cos_t = jnp.concatenate([cos_ref[...]] * ngroups, axis=1)   # (S, re_w) f32
    sin_t = jnp.concatenate([sin_ref[...]] * ngroups, axis=1)   # (S, re_w) f32

    for b in range(B):                          # unrolled; B is tiny
        xb = x_ref[b]                           # (S, D) bf16

        # Fused QKV projection (bf16 MXU, f32 accumulate).  Column layout of
        # wqkv (built offline): [ q_re | k_re | q_im | k_im | v(original) ].
        qkv = jnp.dot(xb, wqkv, preferred_element_type=jnp.float32)

        # Rotary embeddings on the re/im-grouped q|k columns -- pure VPU math:
        #   re' = re*cos - im*sin ; im' = im*cos + re*sin
        re = qkv[:, :re_w]
        im = qkv[:, re_w:2 * re_w]
        re_r = re * cos_t - im * sin_t
        im_r = im * cos_t + re * sin_t
        re_b = re_r.astype(jnp.bfloat16)
        im_b = im_r.astype(jnp.bfloat16)
        v_b = qkv[:, 2 * re_w:].astype(jnp.bfloat16)            # (S, Hkv*Dh)

        # Per-head attention with GQA (query head h -> kv group h // n_rep)
        # via static slices; per-head output is immediately folded into the
        # output projection accumulator (no concat, one live intermediate).
        acc = jnp.zeros((S, D), jnp.float32)
        for h in range(n_heads):
            g = h // n_rep
            q_re = re_b[:, h * dh2:(h + 1) * dh2]
            q_im = im_b[:, h * dh2:(h + 1) * dh2]
            k_re = re_b[:, qre_w + g * dh2: qre_w + (g + 1) * dh2]
            k_im = im_b[:, qre_w + g * dh2: qre_w + (g + 1) * dh2]

            # scores = q . k  (1/sqrt(Dh) already folded into wq columns).
            s = lax.dot_general(q_re, k_re, (((1,), (1,)), ((), ())),
                                preferred_element_type=jnp.float32)
            s = s + lax.dot_general(q_im, k_im, (((1,), (1,)), ((), ())),
                                    preferred_element_type=jnp.float32)

            # Softmax in f32 (matches F.softmax(scores.float(), dim=-1)).
            m = jnp.max(s, axis=-1, keepdims=True)
            p = jnp.exp(s - m)
            denom = jnp.sum(p, axis=-1, keepdims=True)
            probs = p * pl.reciprocal(denom, approx=True)        # EUP vrcp

            vh = v_b[:, g * head_dim:(g + 1) * head_dim]
            ho = jnp.dot(probs.astype(jnp.bfloat16), vh,
                         preferred_element_type=jnp.float32)     # (S, Dh) f32

            # Partial output projection for this head, accumulated in f32.
            acc = acc + jnp.dot(ho.astype(jnp.bfloat16),
                                wo[h * head_dim:(h + 1) * head_dim, :],
                                preferred_element_type=jnp.float32)

        # NOTE: the reference's masked_fill result is discarded (no mask) and
        # dropout(p=0) is the identity.  D < 128 here means a lane-sparse
        # store; unavoidable for this toy output shape.
        o_ref[b] = acc.astype(o_ref.dtype)


# ----------------------------------------------------------------------------
# One-time operand preparation (init time -- NOT per forward).
# ----------------------------------------------------------------------------

def prepare_attention_operands(params, angles, *, n_heads, n_kv_heads):
    """Fold scale into wq, permute wq/wk columns into re|im-grouped RoPE
    layout, concatenate wq|wk|wv, cast weights to bf16, build cos/sin tables.
    """
    wq, wk, wv, wo = params["wq"], params["wk"], params["wv"], params["wo"]
    D = wq.shape[0]
    head_dim = D // n_heads
    dh2 = head_dim // 2
    scale = 1.0 / math.sqrt(head_dim)

    def split_re_im(w, nh):
        # w columns: head-major, interleaved (re, im) pairs within each head.
        w4 = w.reshape(D, nh, dh2, 2)
        return (w4[..., 0].reshape(D, nh * dh2),    # all "re" columns
                w4[..., 1].reshape(D, nh * dh2))    # all "im" columns

    wq_re, wq_im = split_re_im(wq * scale, n_heads)     # scale folded into wq
    wk_re, wk_im = split_re_im(wk, n_kv_heads)
    wqkv = jnp.concatenate([wq_re, wk_re, wq_im, wk_im, wv], axis=1)

    return {
        "wqkv": wqkv.astype(jnp.bfloat16),
        "wo": wo.astype(jnp.bfloat16),
        "cos": jnp.cos(angles).astype(jnp.float32),     # (S, head_dim/2)
        "sin": jnp.sin(angles).astype(jnp.float32),     # (S, head_dim/2)
    }


def attention_forward(ops, x, *, n_heads, n_kv_heads):
    """x: (B, S, D) float32.  ops: output of prepare_attention_operands."""
    B, S, D = x.shape
    head_dim = D // n_heads
    kernel = functools.partial(
        _fused_attention_kernel,
        n_heads=n_heads, n_kv_heads=n_kv_heads, head_dim=head_dim)

    return pl.pallas_call(
        kernel,
        out_shape=jax.ShapeDtypeStruct((B, S, D), x.dtype),
        # No grid: whole (tiny) problem in one invocation -> no per-step
        # overhead, no double-buffering of grid-invariant weights/tables.
        compiler_params=pltpu.CompilerParams(
            vmem_limit_bytes=32 * 1024 * 1024),   # explicit budget; toy config
    )(x.astype(jnp.bfloat16), ops["wqkv"], ops["wo"], ops["cos"], ops["sin"])


# ----------------------------------------------------------------------------
# Rotary angle precompute + pure-jnp f32 reference for sanity checking
# ----------------------------------------------------------------------------

def precompute_angles(head_dim, seq_len, theta=10000.0):
    inv_freq = 1.0 / (theta ** (jnp.arange(0, head_dim, 2, dtype=jnp.float32) / head_dim))
    m = jnp.arange(seq_len, dtype=jnp.float32)
    return jnp.outer(m, inv_freq)                               # (S, Dh/2)


def _apply_rotary_ref(x, cos, sin):
    # x: (B, S, H, Dh); interleaved (even, odd) pairs, like torch.view_as_complex.
    x_r = x[..., 0::2]
    x_i = x[..., 1::2]
    c = cos[None, :, None, :]
    s = sin[None, :, None, :]
    out_r = x_r * c - x_i * s
    out_i = x_r * s + x_i * c
    return jnp.stack([out_r, out_i], axis=-1).reshape(x.shape).astype(x.dtype)


def reference_forward(params, x, angles, *, n_heads, n_kv_heads):
    hi = lax.Precision.HIGHEST
    B, S, D = x.shape
    head_dim = D // n_heads
    n_rep = n_heads // n_kv_heads
    cos, sin = jnp.cos(angles), jnp.sin(angles)
    xq = jnp.einsum("bsd,dn->bsn", x, params["wq"], precision=hi).reshape(B, S, n_heads, head_dim)
    xk = jnp.einsum("bsd,dn->bsn", x, params["wk"], precision=hi).reshape(B, S, n_kv_heads, head_dim)
    xv = jnp.einsum("bsd,dn->bsn", x, params["wv"], precision=hi).reshape(B, S, n_kv_heads, head_dim)
    xq = _apply_rotary_ref(xq, cos, sin)
    xk = _apply_rotary_ref(xk, cos, sin)
    xk = jnp.repeat(xk, n_rep, axis=2)
    xv = jnp.repeat(xv, n_rep, axis=2)
    xq, xk, xv = (jnp.transpose(t, (0, 2, 1, 3)) for t in (xq, xk, xv))
    scores = jnp.einsum("bhqd,bhkd->bhqk", xq, xk, precision=hi) / math.sqrt(head_dim)
    probs = jax.nn.softmax(scores.astype(jnp.float32), axis=-1).astype(xq.dtype)
    out = jnp.einsum("bhqk,bhkd->bhqd", probs, xv, precision=hi)
    out = jnp.transpose(out, (0, 2, 1, 3)).reshape(B, S, n_heads * head_dim)
    return jnp.einsum("bsn,nd->bsd", out, params["wo"], precision=hi)


# ----------------------------------------------------------------------------
# Main
# ----------------------------------------------------------------------------

if __name__ == "__main__":
    # Small config consistent with the module: dim=32, n_heads=4, n_kv_heads=2
    batch, seq_len, dim = 2, 8, 32
    n_heads, n_kv_heads = 4, 2
    head_dim = dim // n_heads

    key = jax.random.PRNGKey(0)
    kx, kq, kk, kv, ko = jax.random.split(key, 5)

    x = jax.random.normal(kx, (batch, seq_len, dim), dtype=jnp.float32)

    # Deterministic weight init (stored as (in, out) so forward is x @ W).
    def init_w(k, fan_in, fan_out):
        bound = 1.0 / math.sqrt(fan_in)
        return jax.random.uniform(k, (fan_in, fan_out), jnp.float32, -bound, bound)

    params = {
        "wq": init_w(kq, dim, n_heads * head_dim),
        "wk": init_w(kk, dim, n_kv_heads * head_dim),
        "wv": init_w(kv, dim, n_kv_heads * head_dim),
        "wo": init_w(ko, n_heads * head_dim, dim),
    }

    angles = precompute_angles(head_dim, seq_len)

    # One-time operand prep (hoisted out of the forward path).
    ops = prepare_attention_operands(params, angles,
                                     n_heads=n_heads, n_kv_heads=n_kv_heads)

    out = attention_forward(ops, x, n_heads=n_heads, n_kv_heads=n_kv_heads)
    out = jax.block_until_ready(out)

    ref = reference_forward(params, x, angles,
                            n_heads=n_heads, n_kv_heads=n_kv_heads)
    assert out.shape == (batch, seq_len, dim)
    # Tolerance accounts for bf16 MXU operands (f32 accumulation) and the
    # approximate EUP reciprocal in the softmax normalization; the reference
    # is full-precision f32.
    assert jnp.allclose(out, ref, atol=2e-2, rtol=2e-2), "Pallas output mismatch"

    print("KERNEL_OK")
</pallas_src>

<mosaic_0001>
module attributes {stable_mosaic.version = 11 : i64} {
  func.func @_fused_attention_kernel(%arg0: memref<2x8x32xbf16, #tpu.memory_space<vmem>>, %arg1: memref<32x64xbf16, #tpu.memory_space<vmem>>, %arg2: memref<32x32xbf16, #tpu.memory_space<vmem>>, %arg3: memref<8x4xf32, #tpu.memory_space<vmem>>, %arg4: memref<8x4xf32, #tpu.memory_space<vmem>>, %arg5: memref<2x8x32xf32, #tpu.memory_space<vmem>>) attributes {dimension_semantics = [], scalar_prefetch = 0 : i64, scratch_operands = 0 : i64, tpu.core_type = #tpu.core_type<tc>} {
    %c0 = arith.constant 0 : index
    %c0_0 = arith.constant 0 : index
    %0 = vector.load %arg1[%c0, %c0_0] : memref<32x64xbf16, #tpu.memory_space<vmem>>, vector<32x64xbf16>
    %c0_1 = arith.constant 0 : index
    %c0_2 = arith.constant 0 : index
    %1 = vector.load %arg2[%c0_1, %c0_2] : memref<32x32xbf16, #tpu.memory_space<vmem>>, vector<32x32xbf16>
    %c0_3 = arith.constant 0 : index
    %c0_4 = arith.constant 0 : index
    %2 = vector.load %arg3[%c0_3, %c0_4] : memref<8x4xf32, #tpu.memory_space<vmem>>, vector<8x4xf32>
    %3 = tpu.concatenate %2, %2, %2, %2, %2, %2 in 1 : vector<8x4xf32>, vector<8x4xf32>, vector<8x4xf32>, vector<8x4xf32>, vector<8x4xf32>, vector<8x4xf32> -> vector<8x24xf32>
    %c0_5 = arith.constant 0 : index
    %c0_6 = arith.constant 0 : index
    %4 = vector.load %arg4[%c0_5, %c0_6] : memref<8x4xf32, #tpu.memory_space<vmem>>, vector<8x4xf32>
    %5 = tpu.concatenate %4, %4, %4, %4, %4, %4 in 1 : vector<8x4xf32>, vector<8x4xf32>, vector<8x4xf32>, vector<8x4xf32>, vector<8x4xf32>, vector<8x4xf32> -> vector<8x24xf32>
    %c0_7 = arith.constant 0 : index
    %c0_8 = arith.constant 0 : index
    %c0_9 = arith.constant 0 : index
    %6 = vector.load %arg0[%c0_7, %c0_8, %c0_9] : memref<2x8x32xbf16, #tpu.memory_space<vmem>>, vector<1x8x32xbf16>
    %7 = vector.shape_cast %6 : vector<1x8x32xbf16> to vector<8x32xbf16>
    %cst = arith.constant dense<0.000000e+00> : vector<8x64xf32>
    %8 = tpu.matmul %7, %0, %cst {dimension_numbers = #tpu.dot_dimension_numbers<[1], [0], [0], [1], [0, 0, 1, 1], [], []>} : vector<8x32xbf16>, vector<32x64xbf16>, vector<8x64xf32> -> vector<8x64xf32>
    %9 = vector.extract_strided_slice %8 {offsets = [0, 0], sizes = [8, 24], strides = [1, 1]} : vector<8x64xf32> to vector<8x24xf32>
    %10 = vector.extract_strided_slice %8 {offsets = [0, 24], sizes = [8, 24], strides = [1, 1]} : vector<8x64xf32> to vector<8x24xf32>
    %11 = arith.mulf %9, %3 : vector<8x24xf32>
    %12 = arith.mulf %10, %5 : vector<8x24xf32>
    %13 = arith.subf %11, %12 : vector<8x24xf32>
    %14 = arith.mulf %10, %3 : vector<8x24xf32>
    %15 = arith.mulf %9, %5 : vector<8x24xf32>
    %16 = arith.addf %14, %15 : vector<8x24xf32>
    %17 = arith.truncf %13 : vector<8x24xf32> to vector<8x24xbf16>
    %18 = arith.truncf %16 : vector<8x24xf32> to vector<8x24xbf16>
    %19 = vector.extract_strided_slice %8 {offsets = [0, 48], sizes = [8, 16], strides = [1, 1]} : vector<8x64xf32> to vector<8x16xf32>
    %20 = arith.truncf %19 : vector<8x16xf32> to vector<8x16xbf16>
    %cst_10 = arith.constant 0.000000e+00 : f32
    %21 = vector.broadcast %cst_10 : f32 to vector<8x32xf32>
    %22 = vector.extract_strided_slice %17 {offsets = [0, 0], sizes = [8, 4], strides = [1, 1]} : vector<8x24xbf16> to vector<8x4xbf16>
    %23 = vector.extract_strided_slice %18 {offsets = [0, 0], sizes = [8, 4], strides = [1, 1]} : vector<8x24xbf16> to vector<8x4xbf16>
    %24 = vector.extract_strided_slice %17 {offsets = [0, 16], sizes = [8, 4], strides = [1, 1]} : vector<8x24xbf16> to vector<8x4xbf16>
    %25 = vector.extract_strided_slice %18 {offsets = [0, 16], sizes = [8, 4], strides = [1, 1]} : vector<8x24xbf16> to vector<8x4xbf16>
    %cst_11 = arith.constant dense<0.000000e+00> : vector<8x8xf32>
    %26 = tpu.matmul %22, %24, %cst_11 {dimension_numbers = #tpu.dot_dimension_numbers<[1], [1], [0], [0], [0, 0, 1, 0], [], []>} : vector<8x4xbf16>, vector<8x4xbf16>, vector<8x8xf32> -> vector<8x8xf32>
    %cst_12 = arith.constant dense<0.000000e+00> : vector<8x8xf32>
    %27 = tpu.matmul %23, %25, %cst_12 {dimension_numbers = #tpu.dot_dimension_numbers<[1], [1], [0], [0], [0, 0, 1, 0], [], []>} : vector<8x4xbf16>, vector<8x4xbf16>, vector<8x8xf32> -> vector<8x8xf32>
    %28 = arith.addf %26, %27 : vector<8x8xf32>
    %cst_13 = arith.constant dense<0xFF800000> : vector<8xf32>
    %29 = vector.multi_reduction <maximumf>, %28, %cst_13 [1] : vector<8x8xf32> to vector<8xf32>
    %30 = vector.shape_cast %29 : vector<8xf32> to vector<8x1xf32>
    %31 = vector.broadcast %30 : vector<8x1xf32> to vector<8x8xf32>
    %32 = arith.subf %28, %31 : vector<8x8xf32>
    %33 = math.exp %32 : vector<8x8xf32>
    %cst_14 = arith.constant dense<0.000000e+00> : vector<8xf32>
    %34 = vector.multi_reduction <add>, %33, %cst_14 [1] : vector<8x8xf32> to vector<8xf32>
    %35 = vector.shape_cast %34 : vector<8xf32> to vector<8x1xf32>
    %36 = tpu.reciprocal %35 {approx = true} : vector<8x1xf32> -> vector<8x1xf32>
    %37 = vector.broadcast %36 : vector<8x1xf32> to vector<8x8xf32>
    %38 = arith.mulf %33, %37 : vector<8x8xf32>
    %39 = vector.extract_strided_slice %20 {offsets = [0, 0], sizes = [8, 8], strides = [1, 1]} : vector<8x16xbf16> to vector<8x8xbf16>
    %40 = arith.truncf %38 : vector<8x8xf32> to vector<8x8xbf16>
    %cst_15 = arith.constant dense<0.000000e+00> : vector<8x8xf32>
    %41 = tpu.matmul %40, %39, %cst_15 {dimension_numbers = #tpu.dot_dimension_numbers<[1], [0], [0], [1], [0, 0, 1, 1], [], []>} : vector<8x8xbf16>, vector<8x8xbf16>, vector<8x8xf32> -> vector<8x8xf32>
    %42 = arith.truncf %41 : vector<8x8xf32> to vector<8x8xbf16>
    %43 = vector.extract_strided_slice %1 {offsets = [0, 0], sizes = [8, 32], strides = [1, 1]} : vector<32x32xbf16> to vector<8x32xbf16>
    %cst_16 = arith.constant dense<0.000000e+00> : vector<8x32xf32>
    %44 = tpu.matmul %42, %43, %cst_16 {dimension_numbers = #tpu.dot_dimension_numbers<[1], [0], [0], [1], [0, 0, 1, 1], [], []>} : vector<8x8xbf16>, vector<8x32xbf16>, vector<8x32xf32> -> vector<8x32xf32>
    %45 = arith.addf %21, %44 : vector<8x32xf32>
    %46 = vector.extract_strided_slice %17 {offsets = [0, 4], sizes = [8, 4], strides = [1, 1]} : vector<8x24xbf16> to vector<8x4xbf16>
    %47 = vector.extract_strided_slice %18 {offsets = [0, 4], sizes = [8, 4], strides = [1, 1]} : vector<8x24xbf16> to vector<8x4xbf16>
    %48 = vector.extract_strided_slice %17 {offsets = [0, 16], sizes = [8, 4], strides = [1, 1]} : vector<8x24xbf16> to vector<8x4xbf16>
    %49 = vector.extract_strided_slice %18 {offsets = [0, 16], sizes = [8, 4], strides = [1, 1]} : vector<8x24xbf16> to vector<8x4xbf16>
    %cst_17 = arith.constant dense<0.000000e+00> : vector<8x8xf32>
    %50 = tpu.matmul %46, %48, %cst_17 {dimension_numbers = #tpu.dot_dimension_numbers<[1], [1], [0], [0], [0, 0, 1, 0], [], []>} : vector<8x4xbf16>, vector<8x4xbf16>, vector<8x8xf32> -> vector<8x8xf32>
    %cst_18 = arith.constant dense<0.000000e+00> : vector<8x8xf32>
    %51 = tpu.matmul %47, %49, %cst_18 {dimension_numbers = #tpu.dot_dimension_numbers<[1], [1], [0], [0], [0, 0, 1, 0], [], []>} : vector<8x4xbf16>, vector<8x4xbf16>, vector<8x8xf32> -> vector<8x8xf32>
    %52 = arith.addf %50, %51 : vector<8x8xf32>
    %cst_19 = arith.constant dense<0xFF800000> : vector<8xf32>
    %53 = vector.multi_reduction <maximumf>, %52, %cst_19 [1] : vector<8x8xf32> to vector<8xf32>
    %54 = vector.shape_cast %53 : vector<8xf32> to vector<8x1xf32>
    %55 = vector.broadcast %54 : vector<8x1xf32> to vector<8x8xf32>
    %56 = arith.subf %52, %55 : vector<8x8xf32>
    %57 = math.exp %56 : vector<8x8xf32>
    %cst_20 = arith.constant dense<0.000000e+00> : vector<8xf32>
    %58 = vector.multi_reduction <add>, %57, %cst_20 [1] : vector<8x8xf32> to vector<8xf32>
    %59 = vector.shape_cast %58 : vector<8xf32> to vector<8x1xf32>
    %60 = tpu.reciprocal %59 {approx = true} : vector<8x1xf32> -> vector<8x1xf32>
    %61 = vector.broadcast %60 : vector<8x1xf32> to vector<8x8xf32>
    %62 = arith.mulf %57, %61 : vector<8x8xf32>
    %63 = vector.extract_strided_slice %20 {offsets = [0, 0], sizes = [8, 8], strides = [1, 1]} : vector<8x16xbf16> to vector<8x8xbf16>
    %64 = arith.truncf %62 : vector<8x8xf32> to vector<8x8xbf16>
    %cst_21 = arith.constant dense<0.000000e+00> : vector<8x8xf32>
    %65 = tpu.matmul %64, %63, %cst_21 {dimension_numbers = #tpu.dot_dimension_numbers<[1], [0], [0], [1], [0, 0, 1, 1], [], []>} : vector<8x8xbf16>, vector<8x8xbf16>, vector<8x8xf32> -> vector<8x8xf32>
    %66 = arith.truncf %65 : vector<8x8xf32> to vector<8x8xbf16>
    %67 = vector.extract_strided_slice %1 {offsets = [8, 0], sizes = [8, 32], strides = [1, 1]} : vector<32x32xbf16> to vector<8x32xbf16>
    %cst_22 = arith.constant dense<0.000000e+00> : vector<8x32xf32>
    %68 = tpu.matmul %66, %67, %cst_22 {dimension_numbers = #tpu.dot_dimension_numbers<[1], [0], [0], [1], [0, 0, 1, 1], [], []>} : vector<8x8xbf16>, vector<8x32xbf16>, vector<8x32xf32> -> vector<8x32xf32>
    %69 = arith.addf %45, %68 : vector<8x32xf32>
    %70 = vector.extract_strided_slice %17 {offsets = [0, 8], sizes = [8, 4], strides = [1, 1]} : vector<8x24xbf16> to vector<8x4xbf16>
    %71 = vector.extract_strided_slice %18 {offsets = [0, 8], sizes = [8, 4], strides = [1, 1]} : vector<8x24xbf16> to vector<8x4xbf16>
    %72 = vector.extract_strided_slice %17 {offsets = [0, 20], sizes = [8, 4], strides = [1, 1]} : vector<8x24xbf16> to vector<8x4xbf16>
    %73 = vector.extract_strided_slice %18 {offsets = [0, 20], sizes = [8, 4], strides = [1, 1]} : vector<8x24xbf16> to vector<8x4xbf16>
    %cst_23 = arith.constant dense<0.000000e+00> : vector<8x8xf32>
    %74 = tpu.matmul %70, %72, %cst_23 {dimension_numbers = #tpu.dot_dimension_numbers<[1], [1], [0], [0], [0, 0, 1, 0], [], []>} : vector<8x4xbf16>, vector<8x4xbf16>, vector<8x8xf32> -> vector<8x8xf32>
    %cst_24 = arith.constant dense<0.000000e+00> : vector<8x8xf32>
    %75 = tpu.matmul %71, %73, %cst_24 {dimension_numbers = #tpu.dot_dimension_numbers<[1], [1], [0], [0], [0, 0, 1, 0], [], []>} : vector<8x4xbf16>, vector<8x4xbf16>, vector<8x8xf32> -> vector<8x8xf32>
    %76 = arith.addf %74, %75 : vector<8x8xf32>
    %cst_25 = arith.constant dense<0xFF800000> : vector<8xf32>
    %77 = vector.multi_reduction <maximumf>, %76, %cst_25 [1] : vector<8x8xf32> to vector<8xf32>
    %78 = vector.shape_cast %77 : vector<8xf32> to vector<8x1xf32>
    %79 = vector.broadcast %78 : vector<8x1xf32> to vector<8x8xf32>
    %80 = arith.subf %76, %79 : vector<8x8xf32>
    %81 = math.exp %80 : vector<8x8xf32>
    %cst_26 = arith.constant dense<0.000000e+00> : vector<8xf32>
    %82 = vector.multi_reduction <add>, %81, %cst_26 [1] : vector<8x8xf32> to vector<8xf32>
    %83 = vector.shape_cast %82 : vector<8xf32> to vector<8x1xf32>
    %84 = tpu.reciprocal %83 {approx = true} : vector<8x1xf32> -> vector<8x1xf32>
    %85 = vector.broadcast %84 : vector<8x1xf32> to vector<8x8xf32>
    %86 = arith.mulf %81, %85 : vector<8x8xf32>
    %87 = vector.extract_strided_slice %20 {offsets = [0, 8], sizes = [8, 8], strides = [1, 1]} : vector<8x16xbf16> to vector<8x8xbf16>
    %88 = arith.truncf %86 : vector<8x8xf32> to vector<8x8xbf16>
    %cst_27 = arith.constant dense<0.000000e+00> : vector<8x8xf32>
    %89 = tpu.matmul %88, %87, %cst_27 {dimension_numbers = #tpu.dot_dimension_numbers<[1], [0], [0], [1], [0, 0, 1, 1], [], []>} : vector<8x8xbf16>, vector<8x8xbf16>, vector<8x8xf32> -> vector<8x8xf32>
    %90 = arith.truncf %89 : vector<8x8xf32> to vector<8x8xbf16>
    %91 = vector.extract_strided_slice %1 {offsets = [16, 0], sizes = [8, 32], strides = [1, 1]} : vector<32x32xbf16> to vector<8x32xbf16>
    %cst_28 = arith.constant dense<0.000000e+00> : vector<8x32xf32>
    %92 = tpu.matmul %90, %91, %cst_28 {dimension_numbers = #tpu.dot_dimension_numbers<[1], [0], [0], [1], [0, 0, 1, 1], [], []>} : vector<8x8xbf16>, vector<8x32xbf16>, vector<8x32xf32> -> vector<8x32xf32>
    %93 = arith.addf %69, %92 : vector<8x32xf32>
    %94 = vector.extract_strided_slice %17 {offsets = [0, 12], sizes = [8, 4], strides = [1, 1]} : vector<8x24xbf16> to vector<8x4xbf16>
    %95 = vector.extract_strided_slice %18 {offsets = [0, 12], sizes = [8, 4], strides = [1, 1]} : vector<8x24xbf16> to vector<8x4xbf16>
    %96 = vector.extract_strided_slice %17 {offsets = [0, 20], sizes = [8, 4], strides = [1, 1]} : vector<8x24xbf16> to vector<8x4xbf16>
    %97 = vector.extract_strided_slice %18 {offsets = [0, 20], sizes = [8, 4], strides = [1, 1]} : vector<8x24xbf16> to vector<8x4xbf16>
    %cst_29 = arith.constant dense<0.000000e+00> : vector<8x8xf32>
    %98 = tpu.matmul %94, %96, %cst_29 {dimension_numbers = #tpu.dot_dimension_numbers<[1], [1], [0], [0], [0, 0, 1, 0], [], []>} : vector<8x4xbf16>, vector<8x4xbf16>, vector<8x8xf32> -> vector<8x8xf32>
    %cst_30 = arith.constant dense<0.000000e+00> : vector<8x8xf32>
    %99 = tpu.matmul %95, %97, %cst_30 {dimension_numbers = #tpu.dot_dimension_numbers<[1], [1], [0], [0], [0, 0, 1, 0], [], []>} : vector<8x4xbf16>, vector<8x4xbf16>, vector<8x8xf32> -> vector<8x8xf32>
    %100 = arith.addf %98, %99 : vector<8x8xf32>
    %cst_31 = arith.constant dense<0xFF800000> : vector<8xf32>
    %101 = vector.multi_reduction <maximumf>, %100, %cst_31 [1] : vector<8x8xf32> to vector<8xf32>
    %102 = vector.shape_cast %101 : vector<8xf32> to vector<8x1xf32>
    %103 = vector.broadcast %102 : vector<8x1xf32> to vector<8x8xf32>
    %104 = arith.subf %100, %103 : vector<8x8xf32>
    %105 = math.exp %104 : vector<8x8xf32>
    %cst_32 = arith.constant dense<0.000000e+00> : vector<8xf32>
    %106 = vector.multi_reduction <add>, %105, %cst_32 [1] : vector<8x8xf32> to vector<8xf32>
    %107 = vector.shape_cast %106 : vector<8xf32> to vector<8x1xf32>
    %108 = tpu.reciprocal %107 {approx = true} : vector<8x1xf32> -> vector<8x1xf32>
    %109 = vector.broadcast %108 : vector<8x1xf32> to vector<8x8xf32>
    %110 = arith.mulf %105, %109 : vector<8x8xf32>
    %111 = vector.extract_strided_slice %20 {offsets = [0, 8], sizes = [8, 8], strides = [1, 1]} : vector<8x16xbf16> to vector<8x8xbf16>
    %112 = arith.truncf %110 : vector<8x8xf32> to vector<8x8xbf16>
    %cst_33 = arith.constant dense<0.000000e+00> : vector<8x8xf32>
    %113 = tpu.matmul %112, %111, %cst_33 {dimension_numbers = #tpu.dot_dimension_numbers<[1], [0], [0], [1], [0, 0, 1, 1], [], []>} : vector<8x8xbf16>, vector<8x8xbf16>, vector<8x8xf32> -> vector<8x8xf32>
    %114 = arith.truncf %113 : vector<8x8xf32> to vector<8x8xbf16>
    %115 = vector.extract_strided_slice %1 {offsets = [24, 0], sizes = [8, 32], strides = [1, 1]} : vector<32x32xbf16> to vector<8x32xbf16>
    %cst_34 = arith.constant dense<0.000000e+00> : vector<8x32xf32>
    %116 = tpu.matmul %114, %115, %cst_34 {dimension_numbers = #tpu.dot_dimension_numbers<[1], [0], [0], [1], [0, 0, 1, 1], [], []>} : vector<8x8xbf16>, vector<8x32xbf16>, vector<8x32xf32> -> vector<8x32xf32>
    %117 = arith.addf %93, %116 : vector<8x32xf32>
    %c0_35 = arith.constant 0 : index
    %c0_36 = arith.constant 0 : index
    %c0_37 = arith.constant 0 : index
    %118 = vector.load %arg5[%c0_35, %c0_36, %c0_37] : memref<2x8x32xf32, #tpu.memory_space<vmem>>, vector<1x8x32xf32>
    %119 = vector.shape_cast %118 : vector<1x8x32xf32> to vector<8x32xf32>
    %120 = vector.shape_cast %117 : vector<8x32xf32> to vector<1x8x32xf32>
    tpu.vector_store %arg5[%c0_35, %c0_36, %c0_37], %120 {strides = array<i32>} : memref<2x8x32xf32, #tpu.memory_space<vmem>>, vector<1x8x32xf32>,
    %c1 = arith.constant 1 : index
    %c0_38 = arith.constant 0 : index
    %c0_39 = arith.constant 0 : index
    %121 = vector.load %arg0[%c1, %c0_38, %c0_39] : memref<2x8x32xbf16, #tpu.memory_space<vmem>>, vector<1x8x32xbf16>
    %122 = vector.shape_cast %121 : vector<1x8x32xbf16> to vector<8x32xbf16>
    %cst_40 = arith.constant dense<0.000000e+00> : vector<8x64xf32>
    %123 = tpu.matmul %122, %0, %cst_40 {dimension_numbers = #tpu.dot_dimension_numbers<[1], [0], [0], [1], [0, 0, 1, 1], [], []>} : vector<8x32xbf16>, vector<32x64xbf16>, vector<8x64xf32> -> vector<8x64xf32>
    %124 = vector.extract_strided_slice %123 {offsets = [0, 0], sizes = [8, 24], strides = [1, 1]} : vector<8x64xf32> to vector<8x24xf32>
    %125 = vector.extract_strided_slice %123 {offsets = [0, 24], sizes = [8, 24], strides = [1, 1]} : vector<8x64xf32> to vector<8x24xf32>
    %126 = arith.mulf %124, %3 : vector<8x24xf32>
    %127 = arith.mulf %125, %5 : vector<8x24xf32>
    %128 = arith.subf %126, %127 : vector<8x24xf32>
    %129 = arith.mulf %125, %3 : vector<8x24xf32>
    %130 = arith.mulf %124, %5 : vector<8x24xf32>
    %131 = arith.addf %129, %130 : vector<8x24xf32>
    %132 = arith.truncf %128 : vector<8x24xf32> to vector<8x24xbf16>
    %133 = arith.truncf %131 : vector<8x24xf32> to vector<8x24xbf16>
    %134 = vector.extract_strided_slice %123 {offsets = [0, 48], sizes = [8, 16], strides = [1, 1]} : vector<8x64xf32> to vector<8x16xf32>
    %135 = arith.truncf %134 : vector<8x16xf32> to vector<8x16xbf16>
    %cst_41 = arith.constant 0.000000e+00 : f32
    %136 = vector.broadcast %cst_41 : f32 to vector<8x32xf32>
    %137 = vector.extract_strided_slice %132 {offsets = [0, 0], sizes = [8, 4], strides = [1, 1]} : vector<8x24xbf16> to vector<8x4xbf16>
    %138 = vector.extract_strided_slice %133 {offsets = [0, 0], sizes = [8, 4], strides = [1, 1]} : vector<8x24xbf16> to vector<8x4xbf16>
    %139 = vector.extract_strided_slice %132 {offsets = [0, 16], sizes = [8, 4], strides = [1, 1]} : vector<8x24xbf16> to vector<8x4xbf16>
    %140 = vector.extract_strided_slice %133 {offsets = [0, 16], sizes = [8, 4], strides = [1, 1]} : vector<8x24xbf16> to vector<8x4xbf16>
    %cst_42 = arith.constant dense<0.000000e+00> : vector<8x8xf32>
    %141 = tpu.matmul %137, %139, %cst_42 {dimension_numbers = #tpu.dot_dimension_numbers<[1], [1], [0], [0], [0, 0, 1, 0], [], []>} : vector<8x4xbf16>, vector<8x4xbf16>, vector<8x8xf32> -> vector<8x8xf32>
    %cst_43 = arith.constant dense<0.000000e+00> : vector<8x8xf32>
    %142 = tpu.matmul %138, %140, %cst_43 {dimension_numbers = #tpu.dot_dimension_numbers<[1], [1], [0], [0], [0, 0, 1, 0], [], []>} : vector<8x4xbf16>, vector<8x4xbf16>, vector<8x8xf32> -> vector<8x8xf32>
    %143 = arith.addf %141, %142 : vector<8x8xf32>
    %cst_44 = arith.constant dense<0xFF800000> : vector<8xf32>
    %144 = vector.multi_reduction <maximumf>, %143, %cst_44 [1] : vector<8x8xf32> to vector<8xf32>
    %145 = vector.shape_cast %144 : vector<8xf32> to vector<8x1xf32>
    %146 = vector.broadcast %145 : vector<8x1xf32> to vector<8x8xf32>
    %147 = arith.subf %143, %146 : vector<8x8xf32>
    %148 = math.exp %147 : vector<8x8xf32>
    %cst_45 = arith.constant dense<0.000000e+00> : vector<8xf32>
    %149 = vector.multi_reduction <add>, %148, %cst_45 [1] : vector<8x8xf32> to vector<8xf32>
    %150 = vector.shape_cast %149 : vector<8xf32> to vector<8x1xf32>
    %151 = tpu.reciprocal %150 {approx = true} : vector<8x1xf32> -> vector<8x1xf32>
    %152 = vector.broadcast %151 : vector<8x1xf32> to vector<8x8xf32>
    %153 = arith.mulf %148, %152 : vector<8x8xf32>
    %154 = vector.extract_strided_slice %135 {offsets = [0, 0], sizes = [8, 8], strides = [1, 1]} : vector<8x16xbf16> to vector<8x8xbf16>
    %155 = arith.truncf %153 : vector<8x8xf32> to vector<8x8xbf16>
    %cst_46 = arith.constant dense<0.000000e+00> : vector<8x8xf32>
    %156 = tpu.matmul %155, %154, %cst_46 {dimension_numbers = #tpu.dot_dimension_numbers<[1], [0], [0], [1], [0, 0, 1, 1], [], []>} : vector<8x8xbf16>, vector<8x8xbf16>, vector<8x8xf32> -> vector<8x8xf32>
    %157 = arith.truncf %156 : vector<8x8xf32> to vector<8x8xbf16>
    %158 = vector.extract_strided_slice %1 {offsets = [0, 0], sizes = [8, 32], strides = [1, 1]} : vector<32x32xbf16> to vector<8x32xbf16>
    %cst_47 = arith.constant dense<0.000000e+00> : vector<8x32xf32>
    %159 = tpu.matmul %157, %158, %cst_47 {dimension_numbers = #tpu.dot_dimension_numbers<[1], [0], [0], [1], [0, 0, 1, 1], [], []>} : vector<8x8xbf16>, vector<8x32xbf16>, vector<8x32xf32> -> vector<8x32xf32>
    %160 = arith.addf %136, %159 : vector<8x32xf32>
    %161 = vector.extract_strided_slice %132 {offsets = [0, 4], sizes = [8, 4], strides = [1, 1]} : vector<8x24xbf16> to vector<8x4xbf16>
    %162 = vector.extract_strided_slice %133 {offsets = [0, 4], sizes = [8, 4], strides = [1, 1]} : vector<8x24xbf16> to vector<8x4xbf16>
    %163 = vector.extract_strided_slice %132 {offsets = [0, 16], sizes = [8, 4], strides = [1, 1]} : vector<8x24xbf16> to vector<8x4xbf16>
    %164 = vector.extract_strided_slice %133 {offsets = [0, 16], sizes = [8, 4], strides = [1, 1]} : vector<8x24xbf16> to vector<8x4xbf16>
    %cst_48 = arith.constant dense<0.000000e+00> : vector<8x8xf32>
    %165 = tpu.matmul %161, %163, %cst_48 {dimension_numbers = #tpu.dot_dimension_numbers<[1], [1], [0], [0], [0, 0, 1, 0], [], []>} : vector<8x4xbf16>, vector<8x4xbf16>, vector<8x8xf32> -> vector<8x8xf32>
    %cst_49 = arith.constant dense<0.000000e+00> : vector<8x8xf32>
    %166 = tpu.matmul %162, %164, %cst_49 {dimension_numbers = #tpu.dot_dimension_numbers<[1], [1], [0], [0], [0, 0, 1, 0], [], []>} : vector<8x4xbf16>, vector<8x4xbf16>, vector<8x8xf32> -> vector<8x8xf32>
    %167 = arith.addf %165, %166 : vector<8x8xf32>
    %cst_50 = arith.constant dense<0xFF800000> : vector<8xf32>
    %168 = vector.multi_reduction <maximumf>, %167, %cst_50 [1] : vector<8x8xf32> to vector<8xf32>
    %169 = vector.shape_cast %168 : vector<8xf32> to vector<8x1xf32>
    %170 = vector.broadcast %169 : vector<8x1xf32> to vector<8x8xf32>
    %171 = arith.subf %167, %170 : vector<8x8xf32>
    %172 = math.exp %171 : vector<8x8xf32>
    %cst_51 = arith.constant dense<0.000000e+00> : vector<8xf32>
    %173 = vector.multi_reduction <add>, %172, %cst_51 [1] : vector<8x8xf32> to vector<8xf32>
    %174 = vector.shape_cast %173 : vector<8xf32> to vector<8x1xf32>
    %175 = tpu.reciprocal %174 {approx = true} : vector<8x1xf32> -> vector<8x1xf32>
    %176 = vector.broadcast %175 : vector<8x1xf32> to vector<8x8xf32>
    %177 = arith.mulf %172, %176 : vector<8x8xf32>
    %178 = vector.extract_strided_slice %135 {offsets = [0, 0], sizes = [8, 8], strides = [1, 1]} : vector<8x16xbf16> to vector<8x8xbf16>
    %179 = arith.truncf %177 : vector<8x8xf32> to vector<8x8xbf16>
    %cst_52 = arith.constant dense<0.000000e+00> : vector<8x8xf32>
    %180 = tpu.matmul %179, %178, %cst_52 {dimension_numbers = #tpu.dot_dimension_numbers<[1], [0], [0], [1], [0, 0, 1, 1], [], []>} : vector<8x8xbf16>, vector<8x8xbf16>, vector<8x8xf32> -> vector<8x8xf32>
    %181 = arith.truncf %180 : vector<8x8xf32> to vector<8x8xbf16>
    %182 = vector.extract_strided_slice %1 {offsets = [8, 0], sizes = [8, 32], strides = [1, 1]} : vector<32x32xbf16> to vector<8x32xbf16>
    %cst_53 = arith.constant dense<0.000000e+00> : vector<8x32xf32>
    %183 = tpu.matmul %181, %182, %cst_53 {dimension_numbers = #tpu.dot_dimension_numbers<[1], [0], [0], [1], [0, 0, 1, 1], [], []>} : vector<8x8xbf16>, vector<8x32xbf16>, vector<8x32xf32> -> vector<8x32xf32>
    %184 = arith.addf %160, %183 : vector<8x32xf32>
    %185 = vector.extract_strided_slice %132 {offsets = [0, 8], sizes = [8, 4], strides = [1, 1]} : vector<8x24xbf16> to vector<8x4xbf16>
    %186 = vector.extract_strided_slice %133 {offsets = [0, 8], sizes = [8, 4], strides = [1, 1]} : vector<8x24xbf16> to vector<8x4xbf16>
    %187 = vector.extract_strided_slice %132 {offsets = [0, 20], sizes = [8, 4], strides = [1, 1]} : vector<8x24xbf16> to vector<8x4xbf16>
    %188 = vector.extract_strided_slice %133 {offsets = [0, 20], sizes = [8, 4], strides = [1, 1]} : vector<8x24xbf16> to vector<8x4xbf16>
    %cst_54 = arith.constant dense<0.000000e+00> : vector<8x8xf32>
    %189 = tpu.matmul %185, %187, %cst_54 {dimension_numbers = #tpu.dot_dimension_numbers<[1], [1], [0], [0], [0, 0, 1, 0], [], []>} : vector<8x4xbf16>, vector<8x4xbf16>, vector<8x8xf32> -> vector<8x8xf32>
    %cst_55 = arith.constant dense<0.000000e+00> : vector<8x8xf32>
    %190 = tpu.matmul %186, %188, %cst_55 {dimension_numbers = #tpu.dot_dimension_numbers<[1], [1], [0], [0], [0, 0, 1, 0], [], []>} : vector<8x4xbf16>, vector<8x4xbf16>, vector<8x8xf32> -> vector<8x8xf32>
    %191 = arith.addf %189, %190 : vector<8x8xf32>
    %cst_56 = arith.constant dense<0xFF800000> : vector<8xf32>
    %192 = vector.multi_reduction <maximumf>, %191, %cst_56 [1] : vector<8x8xf32> to vector<8xf32>
    %193 = vector.shape_cast %192 : vector<8xf32> to vector<8x1xf32>
    %194 = vector.broadcast %193 : vector<8x1xf32> to vector<8x8xf32>
    %195 = arith.subf %191, %194 : vector<8x8xf32>
    %196 = math.exp %195 : vector<8x8xf32>
    %cst_57 = arith.constant dense<0.000000e+00> : vector<8xf32>
    %197 = vector.multi_reduction <add>, %196, %cst_57 [1] : vector<8x8xf32> to vector<8xf32>
    %198 = vector.shape_cast %197 : vector<8xf32> to vector<8x1xf32>
    %199 = tpu.reciprocal %198 {approx = true} : vector<8x1xf32> -> vector<8x1xf32>
    %200 = vector.broadcast %199 : vector<8x1xf32> to vector<8x8xf32>
    %201 = arith.mulf %196, %200 : vector<8x8xf32>
    %202 = vector.extract_strided_slice %135 {offsets = [0, 8], sizes = [8, 8], strides = [1, 1]} : vector<8x16xbf16> to vector<8x8xbf16>
    %203 = arith.truncf %201 : vector<8x8xf32> to vector<8x8xbf16>
    %cst_58 = arith.constant dense<0.000000e+00> : vector<8x8xf32>
    %204 = tpu.matmul %203, %202, %cst_58 {dimension_numbers = #tpu.dot_dimension_numbers<[1], [0], [0], [1], [0, 0, 1, 1], [], []>} : vector<8x8xbf16>, vector<8x8xbf16>, vector<8x8xf32> -> vector<8x8xf32>
    %205 = arith.truncf %204 : vector<8x8xf32> to vector<8x8xbf16>
    %206 = vector.extract_strided_slice %1 {offsets = [16, 0], sizes = [8, 32], strides = [1, 1]} : vector<32x32xbf16> to vector<8x32xbf16>
    %cst_59 = arith.constant dense<0.000000e+00> : vector<8x32xf32>
    %207 = tpu.matmul %205, %206, %cst_59 {dimension_numbers = #tpu.dot_dimension_numbers<[1], [0], [0], [1], [0, 0, 1, 1], [], []>} : vector<8x8xbf16>, vector<8x32xbf16>, vector<8x32xf32> -> vector<8x32xf32>
    %208 = arith.addf %184, %207 : vector<8x32xf32>
    %209 = vector.extract_strided_slice %132 {offsets = [0, 12], sizes = [8, 4], strides = [1, 1]} : vector<8x24xbf16> to vector<8x4xbf16>
    %210 = vector.extract_strided_slice %133 {offsets = [0, 12], sizes = [8, 4], strides = [1, 1]} : vector<8x24xbf16> to vector<8x4xbf16>
    %211 = vector.extract_strided_slice %132 {offsets = [0, 20], sizes = [8, 4], strides = [1, 1]} : vector<8x24xbf16> to vector<8x4xbf16>
    %212 = vector.extract_strided_slice %133 {offsets = [0, 20], sizes = [8, 4], strides = [1, 1]} : vector<8x24xbf16> to vector<8x4xbf16>
    %cst_60 = arith.constant dense<0.000000e+00> : vector<8x8xf32>
    %213 = tpu.matmul %209, %211, %cst_60 {dimension_numbers = #tpu.dot_dimension_numbers<[1], [1], [0], [0], [0, 0, 1, 0], [], []>} : vector<8x4xbf16>, vector<8x4xbf16>, vector<8x8xf32> -> vector<8x8xf32>
    %cst_61 = arith.constant dense<0.000000e+00> : vector<8x8xf32>
    %214 = tpu.matmul %210, %212, %cst_61 {dimension_numbers = #tpu.dot_dimension_numbers<[1], [1], [0], [0], [0, 0, 1, 0], [], []>} : vector<8x4xbf16>, vector<8x4xbf16>, vector<8x8xf32> -> vector<8x8xf32>
    %215 = arith.addf %213, %214 : vector<8x8xf32>
    %cst_62 = arith.constant dense<0xFF800000> : vector<8xf32>
    %216 = vector.multi_reduction <maximumf>, %215, %cst_62 [1] : vector<8x8xf32> to vector<8xf32>
    %217 = vector.shape_cast %216 : vector<8xf32> to vector<8x1xf32>
    %218 = vector.broadcast %217 : vector<8x1xf32> to vector<8x8xf32>
    %219 = arith.subf %215, %218 : vector<8x8xf32>
    %220 = math.exp %219 : vector<8x8xf32>
    %cst_63 = arith.constant dense<0.000000e+00> : vector<8xf32>
    %221 = vector.multi_reduction <add>, %220, %cst_63 [1] : vector<8x8xf32> to vector<8xf32>
    %222 = vector.shape_cast %221 : vector<8xf32> to vector<8x1xf32>
    %223 = tpu.reciprocal %222 {approx = true} : vector<8x1xf32> -> vector<8x1xf32>
    %224 = vector.broadcast %223 : vector<8x1xf32> to vector<8x8xf32>
    %225 = arith.mulf %220, %224 : vector<8x8xf32>
    %226 = vector.extract_strided_slice %135 {offsets = [0, 8], sizes = [8, 8], strides = [1, 1]} : vector<8x16xbf16> to vector<8x8xbf16>
    %227 = arith.truncf %225 : vector<8x8xf32> to vector<8x8xbf16>
    %cst_64 = arith.constant dense<0.000000e+00> : vector<8x8xf32>
    %228 = tpu.matmul %227, %226, %cst_64 {dimension_numbers = #tpu.dot_dimension_numbers<[1], [0], [0], [1], [0, 0, 1, 1], [], []>} : vector<8x8xbf16>, vector<8x8xbf16>, vector<8x8xf32> -> vector<8x8xf32>
    %229 = arith.truncf %228 : vector<8x8xf32> to vector<8x8xbf16>
    %230 = vector.extract_strided_slice %1 {offsets = [24, 0], sizes = [8, 32], strides = [1, 1]} : vector<32x32xbf16> to vector<8x32xbf16>
    %cst_65 = arith.constant dense<0.000000e+00> : vector<8x32xf32>
    %231 = tpu.matmul %229, %230, %cst_65 {dimension_numbers = #tpu.dot_dimension_numbers<[1], [0], [0], [1], [0, 0, 1, 1], [], []>} : vector<8x8xbf16>, vector<8x32xbf16>, vector<8x32xf32> -> vector<8x32xf32>
    %232 = arith.addf %208, %231 : vector<8x32xf32>
    %c1_66 = arith.constant 1 : index
    %c0_67 = arith.constant 0 : index
    %c0_68 = arith.constant 0 : index
    %233 = vector.load %arg5[%c1_66, %c0_67, %c0_68] : memref<2x8x32xf32, #tpu.memory_space<vmem>>, vector<1x8x32xf32>
    %234 = vector.shape_cast %233 : vector<1x8x32xf32> to vector<8x32xf32>
    %235 = vector.shape_cast %232 : vector<8x32xf32> to vector<1x8x32xf32>
    tpu.vector_store %arg5[%c1_66, %c0_67, %c0_68], %235 {strides = array<i32>} : memref<2x8x32xf32, #tpu.memory_space<vmem>>, vector<1x8x32xf32>,
    return
  }
}

</mosaic_0001>

<bundles_post_ra>
// kernel: tpu_custom_call.1
= control target key start
LH: loop header
LB: loop body
LE: loop exit
PB: predicated region body
PF: predicated region fallthrough
CT: control target
= control target key end

     0   :  { %10 = vsyncpa [#allocation3], 0  ;;  %s1430_s0 = inlined_call_operand.hbm [shape: bf16[2,8,32], index: 0, kind: input, shape index: {}]   ;;  %s1431_s1 = inlined_call_operand.vmem [shape: bf16[32,64], index: 1, kind: input, shape index: {}]   ;;  %s1432_s2 = inlined_call_operand.hbm [shape: bf16[32,32], index: 2, kind: input, shape index: {}]   ;;  %s1433_s3 = inlined_call_operand.vmem [shape: f32[8,4], index: 3, kind: input, shape index: {}]   ;;  %s1434_s4 = inlined_call_operand.vmem [shape: f32[8,4], index: 4, kind: input, shape index: {}]   ;;  %s1435_s5 = inlined_call_operand.hbm [shape: f32[2,8,32], index: 5, kind: output, shape index: {}]  }
   0x1   :  { %11 = vsyncpa [#allocation6], 0 }
   0x2   :  { %12 = vsyncpa [#allocation4], 0  ;;  %s17_s20 = sshll.u32 %s1430_s0, 4  ;;  %s1141_s21 = smov [#allocation2]   ;;  %s18_s20 = int_to_ptr.hbm [resolvable:$true] %s17_s20 }
   0x3   :  { %s19_s22 = sshll.u32 %s1141_s21, 4  ;;  %s32_s25 = sshll.u32 %s1432_s2, 4  ;;  %s20_s22 = int_to_ptr.vmem [resolvable:$true] %s19_s22  ;;  %s33_s25 = int_to_ptr.hbm [resolvable:$true] %s32_s25 }
   0x4   :  { %s1142_s26 = smov 64   ;;  %s1143_s27 = smov 4  }
   0x5   :  { %25 = dma.hbm_to_vmem [thread:$0]  %s18_s20, 128, %s20_s22, [#allocation3], %s1142_s26, %s1142_s26, %s1143_s27  }
   0x6   :  { %s1144_s28 = smov [#allocation5]  }
   0x7   :  { %s34_s29 = sshll.u32 %s1144_s28, 4  ;;  %s35_s29 = int_to_ptr.vmem [resolvable:$true] %s34_s29 }
   0x8   :  { %40 = dma.hbm_to_vmem [thread:$0]  %s33_s25, 256, %s35_s29, [#allocation6], %s1142_s26, %s1142_s26, %s1143_s27  }
   0x9   :  { %1135 = dma.done.wait [#allocation3], 128  }
   0xa   :  { %1136 = vsyncadd [#allocation3], 4294967168 }
   0xb   :  { %1137 = dma.done.wait [#allocation6], 256  }
   0xc   :  { %1138 = vsyncadd [#allocation6], 4294967040  ;;  %v89_v0 = vld [vmem:[%s1434_s4] sm:$0xff]  ;;  %v1207_v1 = vld [vmem:[%s1431_s1 + $0x8] sm:$0xff]  ;;  %s1145_s2 = smov 12   ;;  %s1146_s10 = smov 20  }
   0xd   :  { %91 = vrot.lane.b32.xlu0 %v89_v0, %s1143_s27  ;;  %97 = vrot.lane.b32.xlu1 %v89_v0, %s1145_s2  ;;  %v1214_v2 = vld [vmem:[%s1431_s1] sm:$0xff]  ;;  %vm124_vm0 = vcmask 261120   ;;  %s1147_s4 = smov 8   ;;  %s1148_s11 = smov 16   ;;  %vm79_vm1 = vcmask 31744   ;;  %vm81_vm2 = vcmask 64512  }
   0xe   :  { %134 = vmatpush.bf16.msra.mxu0 %v1207_v1  ;;  %103 = vrot.lane.b32.xlu2 %v89_v0, %s1146_s10  ;;  %v111_v3 = vld [vmem:[#allocation2] sm:$0xf]  ;;  %vm83_vm3 = vcmask 97280   ;;  %vm85_vm4 = vcmask 130048   ;;  %vm87_vm5 = vcmask 162816   ;;  %s1149_s1 = smov 24  }
   0xf   :  { %v62_v4 = vld [vmem:[%s1433_s3] sm:$0xff]  ;;  %s1150_s3 = smov 104   ;;  %s1151_s14 = smov 112   ;;  %vm236_vm6 = vcmask 1043456  }
  0x10   :  { %s1152_s15 = smov 88   ;;  %s1153_s16 = smov 80  }
  0x11   :  { %s1154_s17 = smov 100   ;;  %s1155_s18 = smov 124  }
  0x12   :  { %135 = vmatpush.bf16.msra.mxu0 %v1214_v2  ;;  %s1156_s19 = smov 84   ;;  %s1157_s20 = smov 96  }
  0x13   :  { %s1158_s21 = smov 92   ;;  %s1159_s22 = smov 108  }
  0x14   :  { %s1160_s23 = smov 116   ;;  %s1161_s24 = smov 120  }
  0x15   :  { %94 = vrot.lane.b32.xlu0 %v89_v0, %s1147_s4  ;;  %971 = vmatmul.msk.bf16.vlgmr.msra.gmra.mxu0 %vm124_vm0, %v111_v3  ;;  %s1162_s25 = smov 72   ;;  %s1163_s26 = smov [#allocation7]  }
  0x16   :  { %100 = vrot.lane.b32.xlu1 %v89_v0, %s1148_s11  ;;  %s949_s0 = sshll.u32 %s1435_s5, 4  ;;  %s1164_s30 = smov 128   ;;  %s950_s0 = int_to_ptr.hbm [resolvable:$true] %s949_s0 }
  0x1d   :  { %64 = vrot.lane.b32.xlu0 %v62_v4, %s1143_s27  ;;  %s947_s27 = sshll.u32 %s1163_s26, 4  ;;  %s948_s27 = int_to_ptr.vmem [resolvable:$true] %s947_s27 }
  0x1e   :  { %67 = vrot.lane.b32.xlu1 %v62_v4, %s1147_s4 }
  0x25   :  { %73 = vrot.lane.b32.xlu0 %v62_v4, %s1148_s11 }
  0x26   :  { %76 = vrot.lane.b32.xlu1 %v62_v4, %s1146_s10 }
  0x68   :  { %v104_v11 = vpop.permute.xlu2 %103 }
  0x7f   :  { %v92_v5 = vpop.permute.xlu0 %91  ;;  %v98_v6 = vpop.permute.xlu1 %97 }
  0x80   :  { %v106_v7 = vsel %vm79_vm1, %v89_v0, %v92_v5 }
  0x87   :  { %v95_v8 = vpop.permute.xlu0 %94 }
  0x88   :  { %v107_v9 = vsel %vm81_vm2, %v106_v7, %v95_v8  ;;  %v101_v10 = vpop.permute.xlu1 %100 }
  0x89   :  { %v108_v12 = vsel %vm83_vm3, %v107_v9, %v98_v6 }
  0x8a   :  { %v109_v13 = vsel %vm85_vm4, %v108_v12, %v101_v10  ;;  %v544_v12 = vld [vmem:[#allocation2 + $0x4] sm:$0xf] }
  0x8b   :  { %v1228_v14 = vsel %vm87_vm5, %v109_v13, %v104_v11 }
  0x8c   :  { %143 = vrot.lane.b32.xlu2 %v1228_v14, %s1149_s1 }
  0x8f   :  { %v65_v18 = vpop.permute.xlu0 %64 }
  0x90   :  { %v68_v19 = vpop.permute.xlu1 %67  ;;  %v80_v22 = vsel %vm79_vm1, %v62_v4, %v65_v18 }
  0x91   :  { %v82_v24 = vsel %vm81_vm2, %v80_v22, %v68_v19 }
  0x92   :  { %v137_v15 = vpop.f32.mrf.mxu0 }
  0x93   :  { %v157_v16 = vmul.f32 %v137_v15, %v1228_v14  ;;  %v165_v43 = vpack.c.bf16 %v137_v15, %v137_v15 }
  0x94   :  { %70 = vrot.lane.b32.xlu2 %v62_v4, %s1145_s2 }
  0x95   :  { %159 = vrot.lane.b32.xlu1 %v157_v16, %s1149_s1  ;;  %v229_v44 = vunpack.c.l.b16 %v165_v43 }
  0x97   :  { %v74_v23 = vpop.permute.xlu0 %73  ;;  %v1258_v45 = vpack.c.b16 %v229_v44, %v229_v44 }
  0x98   :  { %v77_v26 = vpop.permute.xlu1 %76 }
  0x9a   :  { %v139_v17 = vpop.f32.mrf.mxu0 }
  0xe6   :  { %v1235_v20 = vpop.permute.xlu2 %143 }
  0xe7   :  { %v146_v21 = vmul.f32 %v1235_v20, %v137_v15 }
  0xe9   :  { %148 = vrot.lane.b32.xlu2 %v146_v21, %s1150_s3 }
  0xee   :  { %v71_v25 = vpop.permute.xlu2 %70 }
  0xef   :  { %v84_v27 = vsel %vm83_vm3, %v82_v24, %v71_v25  ;;  %v58_v25 = vld [vmem:[#allocation5] sm:$0xf] }
  0xf0   :  { %v86_v28 = vsel %vm85_vm4, %v84_v27, %v74_v23 }
  0xf1   :  { %v1244_v29 = vsel %vm87_vm5, %v86_v28, %v77_v26  ;;  %v342_v26 = vsel %vm236_vm6, %v58_v25, 0 }
  0xf2   :  { %153 = vrot.lane.b32.xlu0 %v1244_v29, %s1149_s1  ;;  %v141_v30 = vmul.f32 %v137_v15, %v1244_v29 }
 0x107   :  { %v160_v38 = vpop.permute.xlu1 %159 }
 0x143   :  { %v149_v31 = vpop.permute.xlu2 %148 }
 0x144   :  { %v151_v32 = vsub.f32 %v141_v30, %v149_v31 }
 0x146   :  { %v163_v33 = vpack.c.bf16 %v151_v32, %v151_v32 }
 0x148   :  { %v193_v34 = vunpack.c.l.b16 %v163_v33 }
 0x14a   :  { %v1249_v35 = vpack.c.b16 %v193_v34, %v193_v34 }
 0x14c   :  { %195 = vrot.lane.b32.xlu2 %v1249_v35, %s1151_s14 }
 0x164   :  { %v1253_v36 = vpop.permute.xlu0 %153 }
 0x165   :  { %v156_v37 = vmul.f32 %v1253_v36, %v137_v15 }
 0x167   :  { %v162_v39 = vadd.f32 %v160_v38, %v156_v37 }
 0x169   :  { %v164_v40 = vpack.c.bf16 %v162_v39, %v162_v39 }
 0x16b   :  { %v167_v41 = vunpack.c.l.b16 %v164_v40 }
 0x16d   :  { %v168_v42 = vpack.c.b16 %v167_v41, %v167_v41 }
 0x16f   :  { %169 = vrot.lane.b32.xlu1 %v168_v42, %s1150_s3  ;;  %171 = vrot.lane.b32.xlu0 %v168_v42, %s1152_s15 }
 0x177   :  { %231 = vrot.lane.b32.xlu1 %v1258_v45, %s1153_s16 }
 0x17f   :  { %254 = vrot.lane.b32.xlu1 %v168_v42, %s1154_s17 }
 0x187   :  { %272 = vrot.lane.b32.xlu1 %v1249_v35, %s1155_s18 }
 0x18f   :  { %359 = vrot.lane.b32.xlu1 %v168_v42, %s1156_s19 }
 0x197   :  { %357 = vrot.lane.b32.xlu1 %v168_v42, %s1157_s20 }
 0x1a6   :  { %v196_v46 = vpop.permute.xlu2 %195 }
 0x1a7   :  { %v201_v47 = vsel %vm79_vm1, %v196_v46, 0 }
 0x1a8   :  { %210 = vmatpush.bf16.xpose.msra.mxu2 %v201_v47  ;;  %284 = vmatpush.bf16.xpose.msrb.mxu0 %v201_v47 }
 0x1af   :  { %973 = vmatmul.msk.bf16.vlgmr.msra.gmra.mxu2 %vm79_vm1, %v163_v33 }
 0x1e1   :  { %v170_v48 = vpop.permute.xlu1 %169  ;;  %v172_v49 = vpop.permute.xlu0 %171 }
 0x1e2   :  { %v177_v50 = vsel %vm79_vm1, %v172_v49, 0 }
 0x1e3   :  { %186 = vmatpush.bf16.xpose.msra.mxu1 %v177_v50 }
 0x1e9   :  { %v232_v51 = vpop.permute.xlu1 %231 }
 0x1ea   :  { %972 = vmatmul.msk.bf16.vlgmr.msra.gmra.mxu1 %vm79_vm1, %v170_v48  ;;  %v238_v52 = vsel %vm236_vm6, %v232_v51, 0 }
 0x1eb   :  { %247 = vmatpush.bf16.msra.mxu3 %v238_v52  ;;  %312 = vmatpush.bf16.msrb.mxu1 %v238_v52 }
 0x1ef   :  { %266 = vmatpush.bf16.xpose.msrb.mxu3 %v177_v50 }
 0x1f1   :  { %v255_v53 = vpop.permute.xlu1 %254 }
 0x1f9   :  { %v273_v54 = vpop.permute.xlu1 %272 }
 0x1fa   :  { %976 = vmatmul.msk.bf16.vlgmr.msrb.gmra.mxu0 %vm79_vm1, %v273_v54 }
 0x201   :  { %v360_v55 = vpop.permute.xlu1 %359 }
 0x202   :  { %v365_v56 = vsel %vm79_vm1, %v360_v55, 0 }
 0x203   :  { %374 = vmatpush.bf16.xpose.msra.mxu0 %v365_v56 }
 0x209   :  { %v358_v57 = vpop.permute.xlu1 %357 }
 0x20a   :  { %980 = vmatmul.msk.bf16.vlgmr.msra.gmra.mxu0 %vm79_vm1, %v358_v57 }
 0x20b   :  { %469 = vmatpush.bf16.xpose.msrb.mxu0 %v365_v56 }
 0x213   :  { %554 = vmatpush.bf16.msra.mxu0 %v1207_v1 }
 0x217   :  { %555 = vmatpush.bf16.msra.mxu0 %v1214_v2 }
 0x232   :  { %v212_v58 = vpop.f32.mrf.mxu2 }
 0x23a   :  { %v214_v59 = vpop.f32.mrf.mxu2 }
 0x267   :  { %v188_v60 = vpop.f32.mrf.mxu1 }
 0x268   :  { %v213_v61 = vadd.f32 %v212_v58, %v188_v60 }
 0x26a   :  { %v216_v62 = vsel %vm81_vm2, %v213_v61, -inf }
 0x26b   :  { %217 = vmax.xlane.f32.xlu2 %v216_v62 }
 0x26f   :  { %v190_v63 = vpop.f32.mrf.mxu1 }
 0x277   :  { %v286_v0 = vpop.f32.mrf.mxu0 }
 0x27f   :  { %v288_v3 = vpop.f32.mrf.mxu0 }
 0x280   :  { %v59_v3 = vld [vmem:[#allocation5 + $0x4] sm:$0xf] }
 0x283   :  { %457 = vrot.lane.b32.xlu2 %v168_v42, %s1158_s21 }
 0x287   :  { %v1279_v4 = vpop.f32.mrf.mxu0 }
 0x28b   :  { %382 = vrot.lane.b32.xlu2 %v1249_v35, %s1159_s22 }
 0x28f   :  { %v378_v1 = vpop.f32.mrf.mxu0 }
 0x290   :  { %v1346_v1 = vsel %vm236_vm6, %v59_v3, 0 }
 0x291   :  { %332 = vmatpush.bf16.msrb.mxu2 %v1346_v1 }
 0x2de   :  { %v218_v2 = vpop.xlane.xlu2 %217 }
 0x2df   :  { %v219_v5 = vsub.f32 %v213_v61, %v218_v2 }
 0x2e1   :  { %v220_v6 = vmul.f32 1.442695, %v219_v5 }
 0x2e3   :  { %1031 = vpow2.f32 %v220_v6 }
 0x2e6   :  { %v458_v7 = vpop.permute.xlu2 %457 }
 0x2e7   :  { %984 = vmatmul.msk.bf16.vlgmr.msrb.gmra.mxu0 %vm79_vm1, %v458_v7 }
 0x2e9   :  { %v1032_v8 = vpop.eup %1031 }
 0x2ea   :  { %v222_v9 = vsel %vm81_vm2, %v1032_v8, 0.0 }
 0x2eb   :  { %223 = vadd.xlane.f32.xlu0 %v222_v9 }
 0x2ee   :  { %v383_v10 = vpop.permute.xlu2 %382 }
 0x2ef   :  { %v1286_v11 = vsel %vm79_vm1, %v383_v10, 0 }
 0x2f0   :  { %397 = vmatpush.bf16.xpose.msra.mxu1 %v1286_v11 }
 0x2f7   :  { %988 = vmatmul.msk.bf16.vlgmr.msra.gmra.mxu0 %vm124_vm0, %v544_v12 }
 0x35e   :  { %v224_v13 = vpop.xlane.xlu0 %223 }
 0x35f   :  { %1033 = vrcp.f32 %v224_v13 }
 0x364   :  { %v1290_v15 = vpop.f32.mrf.mxu0 }
 0x365   :  { %v1034_v16 = vpop.eup %1033 }
 0x366   :  { %v226_v17 = vmul.f32 %v1034_v16, %v1032_v8 }
 0x368   :  { %v227_v18 = vpack.c.bf16 %v226_v17, %v226_v17 }
 0x36a   :  { %974 = vmatmul.msk.bf16.vlgmr.msra.gmra.mxu3 %vm81_vm2, %v227_v18 }
 0x36b   :  { %351 = vmatpush.bf16.msra.mxu3 %v342_v26 }
 0x36c   :  { %v473_v19 = vpop.f32.mrf.mxu0 }
 0x374   :  { %v1293_v21 = vpop.f32.mrf.mxu0 }
 0x375   :  { %v569_v22 = vmul.f32 %v1293_v21, %v1228_v14  ;;  %v562_v23 = vmul.f32 %v1293_v21, %v1235_v20  ;;  %v568_v14 = vmul.f32 %v1293_v21, %v1253_v36  ;;  %v561_v28 = vmul.f32 %v1293_v21, %v1244_v29 }
 0x377   :  { %571 = vrot.lane.b32.xlu0 %v569_v22, %s1149_s1  ;;  %564 = vrot.lane.b32.xlu2 %v562_v23, %s1150_s3 }
 0x37a   :  { %975 = vmatmul.msk.bf16.vlgmr.msrb.gmra.mxu3 %vm79_vm1, %v255_v53 }
 0x37c   :  { %v559_v24 = vpop.f32.mrf.mxu0 }
 0x37f   :  { %475 = vrot.lane.b32.xlu2 %v1249_v35, %s1160_s23 }
 0x3d1   :  { %v565_v27 = vpop.permute.xlu2 %564 }
 0x3d2   :  { %v567_v31 = vsub.f32 %v561_v28, %v565_v27 }
 0x3d4   :  { %v1309_v38 = vpack.c.bf16 %v567_v31, %v567_v31 }
 0x3d6   :  { %v605_v36 = vunpack.c.l.b16 %v1309_v38 }
 0x3d8   :  { %v1317_v41 = vpack.c.b16 %v605_v36, %v605_v36 }
 0x3d9   :  { %v476_v61 = vpop.permute.xlu2 %475 }
 0x3e9   :  { %v572_v20 = vpop.permute.xlu0 %571 }
 0x3ea   :  { %v574_v30 = vadd.f32 %v572_v20, %v568_v14 }
 0x3ec   :  { %v576_v32 = vpack.c.bf16 %v574_v30, %v574_v30 }
 0x3ed   :  { %v249_v33 = vpop.f32.mrf.mxu3 }
 0x3ee   :  { %v579_v34 = vunpack.c.l.b16 %v576_v32  ;;  %v253_v37 = vpack.c.bf16 %v249_v33, %v249_v33 }
 0x3f0   :  { %v1311_v39 = vpack.c.b16 %v579_v34, %v579_v34  ;;  %979 = vmatmul.msk.bf16.vlgmr.msra.gmra.mxu3 %vm81_vm2, %v253_v37 }
 0x3f2   :  { %581 = vrot.lane.b32.xlu2 %v1311_v39, %s1150_s3 }
 0x3f5   :  { %v251_v40 = vpop.f32.mrf.mxu3 }
 0x3fa   :  { %683 = vrot.lane.b32.xlu2 %v1317_v41, %s1155_s18 }
 0x3fd   :  { %v268_v29 = vpop.f32.mrf.mxu3 }
 0x3fe   :  { %v287_v42 = vadd.f32 %v286_v0, %v268_v29 }
 0x400   :  { %v290_v43 = vsel %vm81_vm2, %v287_v42, -inf }
 0x401   :  { %291 = vmax.xlane.f32.xlu1 %v290_v43 }
 0x405   :  { %v270_v44 = vpop.f32.mrf.mxu3 }
 0x41a   :  { %607 = vrot.lane.b32.xlu1 %v1317_v41, %s1151_s14 }
 0x44c   :  { %v582_v63 = vpop.permute.xlu2 %581 }
 0x454   :  { %v684_v0 = vpop.permute.xlu2 %683 }
 0x473   :  { %v1324_v46 = vpop.f32.mrf.mxu3 }
 0x474   :  { %v292_v47 = vpop.xlane.xlu1 %291 }
 0x475   :  { %v293_v48 = vsub.f32 %v287_v42, %v292_v47  ;;  %v577_v42 = vpack.c.bf16 %v1293_v21, %v1293_v21 }
 0x477   :  { %v294_v49 = vmul.f32 1.442695, %v293_v48  ;;  %v641_v43 = vunpack.c.l.b16 %v577_v42 }
 0x479   :  { %1035 = vpow2.f32 %v294_v49  ;;  %v1373_v44 = vpack.c.b16 %v641_v43, %v641_v43 }
 0x47b   :  { %v355_v50 = vpop.f32.mrf.mxu3 }
 0x47f   :  { %v1036_v51 = vpop.eup %1035 }
 0x480   :  { %v296_v52 = vsel %vm81_vm2, %v1036_v51, 0.0 }
 0x481   :  { %297 = vadd.xlane.f32.xlu0 %v296_v52 }
 0x48c   :  { %v608_v60 = vpop.permute.xlu1 %607 }
 0x48d   :  { %v1339_v62 = vsel %vm79_vm1, %v608_v60, 0 }
 0x495   :  { %380 = vrot.lane.b32.xlu0 %v1249_v35, %s1161_s24 }
 0x49d   :  { %583 = vrot.lane.b32.xlu0 %v1311_v39, %s1152_s15 }
 0x4a5   :  { %665 = vrot.lane.b32.xlu0 %v1311_v39, %s1154_s17 }
 0x4f4   :  { %v298_v53 = vpop.xlane.xlu0 %297 }
 0x4f5   :  { %1037 = vrcp.f32 %v298_v53 }
 0x4fb   :  { %v1038_v54 = vpop.eup %1037 }
 0x4fc   :  { %v300_v55 = vmul.f32 %v1038_v54, %v1036_v51 }
 0x4fe   :  { %v301_v56 = vpack.c.bf16 %v300_v55, %v300_v55 }
 0x500   :  { %977 = vmatmul.msk.bf16.vlgmr.msrb.gmra.mxu1 %vm81_vm2, %v301_v56 }
 0x501   :  { %487 = vmatpush.bf16.xpose.msrb.mxu1 %v1286_v11 }
 0x507   :  { %v381_v57 = vpop.permute.xlu0 %380 }
 0x50f   :  { %v584_v58 = vpop.permute.xlu0 %583 }
 0x510   :  { %v589_v59 = vsel %vm79_vm1, %v584_v58, 0  ;;  %981 = vmatmul.msk.bf16.vlgmr.msra.gmra.mxu1 %vm79_vm1, %v381_v57 }
 0x511   :  { %598 = vmatpush.bf16.xpose.msra.mxu1 %v589_v59  ;;  %677 = vmatpush.bf16.xpose.msrb.mxu0 %v589_v59 }
 0x517   :  { %v666_v35 = vpop.permute.xlu0 %665 }
 0x518   :  { %992 = vmatmul.msk.bf16.vlgmr.msrb.gmra.mxu0 %vm79_vm1, %v666_v35 }
 0x519   :  { %756 = vmatpush.bf16.msra.mxu0 %v342_v26 }
 0x520   :  { %985 = vmatmul.msk.bf16.vlgmr.msrb.gmra.mxu1 %vm79_vm1, %v476_v61 }
 0x521   :  { %695 = vmatpush.bf16.xpose.msrb.mxu1 %v1339_v62 }
 0x530   :  { %989 = vmatmul.msk.bf16.vlgmr.msra.gmra.mxu1 %vm79_vm1, %v582_v63 }
 0x540   :  { %993 = vmatmul.msk.bf16.vlgmr.msrb.gmra.mxu1 %vm79_vm1, %v684_v0  ;;  %v60_v0 = vld [vmem:[#allocation5 + $0x8] sm:$0xf] }
 0x541   :  { %v441_v3 = vsel %vm236_vm6, %v60_v0, 0 }
 0x542   :  { %450 = vmatpush.bf16.msrb.mxu3 %v441_v3  ;;  %852 = vmatpush.bf16.msrb.mxu0 %v441_v3 }
 0x57d   :  { %v314_v2 = vpop.f32.mrf.mxu1 }
 0x57e   :  { %v318_v5 = vpack.c.bf16 %v314_v2, %v314_v2 }
 0x580   :  { %978 = vmatmul.msk.bf16.vlgmr.msrb.gmra.mxu2 %vm81_vm2, %v318_v5 }
 0x585   :  { %v316_v6 = vpop.f32.mrf.mxu1 }
 0x58d   :  { %v399_v7 = vpop.f32.mrf.mxu1 }
 0x58e   :  { %v400_v8 = vadd.f32 %v399_v7, %v1279_v4  ;;  %v61_v7 = vld [vmem:[#allocation5 + $0xc] sm:$0xf] }
 0x590   :  { %v403_v9 = vsel %vm81_vm2, %v400_v8, -inf }
 0x591   :  { %404 = vmax.xlane.f32.xlu0 %v403_v9 }
 0x595   :  { %v401_v10 = vpop.f32.mrf.mxu1  ;;  %v679_v11 = vpop.f32.mrf.mxu0 }
 0x59d   :  { %v489_v12 = vpop.f32.mrf.mxu1  ;;  %v681_v13 = vpop.f32.mrf.mxu0 }
 0x59e   :  { %v490_v16 = vadd.f32 %v489_v12, %v1290_v15 }
 0x5a0   :  { %v493_v17 = vsel %vm81_vm2, %v490_v16, -inf }
 0x5a1   :  { %494 = vmax.xlane.f32.xlu2 %v493_v17 }
 0x5a5   :  { %v491_v18 = vpop.f32.mrf.mxu1 }
 0x5ad   :  { %v1354_v19 = vpop.f32.mrf.mxu1 }
 0x5b5   :  { %v602_v22 = vpop.f32.mrf.mxu1 }
 0x5b9   :  { %415 = vrot.lane.b32.xlu2 %v1258_v45, %s1162_s25 }
 0x5bd   :  { %v697_v4 = vpop.f32.mrf.mxu1 }
 0x5be   :  { %v698_v23 = vadd.f32 %v697_v4, %v679_v11 }
 0x5c0   :  { %v701_v24 = vsel %vm81_vm2, %v698_v23, -inf }
 0x5c1   :  { %764 = vrot.lane.b32.xlu2 %v1311_v39, %s1156_s19  ;;  %702 = vmax.xlane.f32.xlu1 %v701_v24 }
 0x5c5   :  { %v699_v15 = vpop.f32.mrf.mxu1 }
 0x5c9   :  { %785 = vrot.lane.b32.xlu2 %v1317_v41, %s1161_s24 }
 0x5d1   :  { %877 = vrot.lane.b32.xlu2 %v1317_v41, %s1160_s23 }
 0x603   :  { %v1365_v25 = vpop.f32.mrf.mxu2 }
 0x604   :  { %v405_v26 = vpop.xlane.xlu0 %404 }
 0x605   :  { %v406_v14 = vsub.f32 %v400_v8, %v405_v26  ;;  %v1398_v8 = vsel %vm236_vm6, %v61_v7, 0 }
 0x606   :  { %535 = vmatpush.bf16.msra.mxu3 %v1398_v8 }
 0x607   :  { %v407_v45 = vmul.f32 1.442695, %v406_v14 }
 0x609   :  { %1039 = vpow2.f32 %v407_v45 }
 0x60b   :  { %v336_v27 = vpop.f32.mrf.mxu2 }
 0x60f   :  { %v1040_v20 = vpop.eup %1039 }
 0x610   :  { %v409_v28 = vsel %vm81_vm2, %v1040_v20, 0.0 }
 0x611   :  { %410 = vadd.xlane.f32.xlu0 %v409_v28 }
 0x614   :  { %v495_v30 = vpop.xlane.xlu2 %494 }
 0x615   :  { %v496_v31 = vsub.f32 %v490_v16, %v495_v30 }
 0x617   :  { %v497_v32 = vmul.f32 1.442695, %v496_v31 }
 0x619   :  { %1041 = vpow2.f32 %v497_v32 }
 0x61c   :  { %v416_v33 = vpop.permute.xlu2 %415 }
 0x61d   :  { %v421_v34 = vsel %vm236_vm6, %v416_v33, 0 }
 0x61e   :  { %430 = vmatpush.bf16.msra.mxu2 %v421_v34 }
 0x61f   :  { %v1042_v37 = vpop.eup %1041 }
 0x620   :  { %v499_v36 = vsel %vm81_vm2, %v1042_v37, 0.0 }
 0x621   :  { %500 = vadd.xlane.f32.xlu0 %v499_v36 }
 0x622   :  { %515 = vmatpush.bf16.msrb.mxu2 %v421_v34 }
 0x624   :  { %v765_v40 = vpop.permute.xlu2 %764 }
 0x625   :  { %v770_v29 = vsel %vm79_vm1, %v765_v40, 0 }
 0x626   :  { %779 = vmatpush.bf16.xpose.msra.mxu1 %v770_v29 }
 0x62c   :  { %v786_v5 = vpop.permute.xlu2 %785 }
 0x62e   :  { %871 = vmatpush.bf16.xpose.msrb.mxu1 %v770_v29 }
 0x634   :  { %v703_v47 = vpop.xlane.xlu1 %702  ;;  %v878_v6 = vpop.permute.xlu2 %877 }
 0x635   :  { %v704_v48 = vsub.f32 %v698_v23, %v703_v47  ;;  %643 = vrot.lane.b32.xlu0 %v1373_v44, %s1153_s16 }
 0x637   :  { %v705_v49 = vmul.f32 1.442695, %v704_v48 }
 0x639   :  { %1043 = vpow2.f32 %v705_v49 }
 0x63d   :  { %762 = vrot.lane.b32.xlu0 %v1311_v39, %s1157_s20 }
 0x63f   :  { %v1044_v50 = vpop.eup %1043 }
 0x640   :  { %v707_v51 = vsel %vm81_vm2, %v1044_v50, 0.0 }
 0x641   :  { %708 = vadd.xlane.f32.xlu1 %v707_v51 }
 0x645   :  { %859 = vrot.lane.b32.xlu0 %v1311_v39, %s1158_s21 }
 0x65a   :  { %787 = vrot.lane.b32.xlu1 %v1317_v41, %s1159_s22 }
 0x684   :  { %v411_v21 = vpop.xlane.xlu0 %410 }
 0x685   :  { %1045 = vrcp.f32 %v411_v21 }
 0x68b   :  { %v1046_v52 = vpop.eup %1045 }
 0x68c   :  { %v413_v53 = vmul.f32 %v1046_v52, %v1040_v20 }
 0x68e   :  { %v414_v54 = vpack.c.bf16 %v413_v53, %v413_v53 }
 0x690   :  { %982 = vmatmul.msk.bf16.vlgmr.msra.gmra.mxu2 %vm81_vm2, %v414_v54 }
 0x691   :  { %622 = vmatpush.bf16.xpose.msra.mxu2 %v1339_v62 }
 0x694   :  { %v501_v55 = vpop.xlane.xlu0 %500 }
 0x695   :  { %1047 = vrcp.f32 %v501_v55 }
 0x69b   :  { %v1048_v56 = vpop.eup %1047 }
 0x69c   :  { %v503_v57 = vmul.f32 %v1048_v56, %v1042_v37  ;;  %v354_v37 = vadd.f32 %v1324_v46, %v1365_v25 }
 0x69e   :  { %v504_v58 = vpack.c.bf16 %v503_v57, %v503_v57 }
 0x6a0   :  { %986 = vmatmul.msk.bf16.vlgmr.msrb.gmra.mxu2 %vm81_vm2, %v504_v58 }
 0x6a7   :  { %v644_v39 = vpop.permute.xlu0 %643 }
 0x6a8   :  { %v649_v59 = vsel %vm236_vm6, %v644_v39, 0 }
 0x6a9   :  { %723 = vmatpush.bf16.msrb.mxu2 %v649_v59 }
 0x6af   :  { %v763_v41 = vpop.permute.xlu0 %762 }
 0x6b0   :  { %990 = vmatmul.msk.bf16.vlgmr.msra.gmra.mxu2 %vm79_vm1, %v1309_v38  ;;  %997 = vmatmul.msk.bf16.vlgmr.msra.gmra.mxu1 %vm79_vm1, %v763_v41 }
 0x6b4   :  { %v709_v35 = vpop.xlane.xlu1 %708 }
 0x6b5   :  { %1049 = vrcp.f32 %v709_v35 }
 0x6b7   :  { %v860_v63 = vpop.permute.xlu0 %859 }
 0x6bb   :  { %v1050_v60 = vpop.eup %1049 }
 0x6bc   :  { %v711_v61 = vmul.f32 %v1050_v60, %v1044_v50 }
 0x6be   :  { %v712_v62 = vpack.c.bf16 %v711_v61, %v711_v61 }
 0x6c0   :  { %994 = vmatmul.msk.bf16.vlgmr.msrb.gmra.mxu2 %vm81_vm2, %v712_v62  ;;  %1001 = vmatmul.msk.bf16.vlgmr.msrb.gmra.mxu1 %vm79_vm1, %v860_v63 }
 0x6cc   :  { %v788_v2 = vpop.permute.xlu1 %787 }
 0x6cd   :  { %v793_v38 = vsel %vm79_vm1, %v788_v2, 0 }
 0x6ce   :  { %802 = vmatpush.bf16.xpose.msra.mxu2 %v793_v38 }
 0x6d5   :  { %998 = vmatmul.msk.bf16.vlgmr.msra.gmra.mxu2 %vm79_vm1, %v786_v5 }
 0x6d6   :  { %889 = vmatpush.bf16.xpose.msrb.mxu2 %v793_v38 }
 0x6e5   :  { %1002 = vmatmul.msk.bf16.vlgmr.msrb.gmra.mxu2 %vm79_vm1, %v878_v6 }
 0x713   :  { %v432_v9 = vpop.f32.mrf.mxu2 }
 0x714   :  { %v436_v10 = vpack.c.bf16 %v432_v9, %v432_v9 }
 0x716   :  { %983 = vmatmul.msk.bf16.vlgmr.msrb.gmra.mxu3 %vm81_vm2, %v436_v10 }
 0x717   :  { %658 = vmatpush.bf16.msrb.mxu3 %v649_v59 }
 0x71b   :  { %v434_v11 = vpop.f32.mrf.mxu2 }
 0x723   :  { %v517_v12 = vpop.f32.mrf.mxu2 }
 0x724   :  { %v521_v13 = vpack.c.bf16 %v517_v12, %v517_v12 }
 0x726   :  { %987 = vmatmul.msk.bf16.vlgmr.msra.gmra.mxu3 %vm81_vm2, %v521_v13 }
 0x727   :  { %740 = vmatpush.bf16.msra.mxu3 %v1346_v1 }
 0x72b   :  { %v519_v16 = vpop.f32.mrf.mxu2 }
 0x72d   :  { %v781_v17 = vpop.f32.mrf.mxu1 }
 0x733   :  { %v624_v18 = vpop.f32.mrf.mxu2 }
 0x734   :  { %v625_v22 = vadd.f32 %v624_v18, %v1354_v19 }
 0x735   :  { %v783_v4 = vpop.f32.mrf.mxu1 }
 0x736   :  { %v628_v23 = vsel %vm81_vm2, %v625_v22, -inf }
 0x737   :  { %629 = vmax.xlane.f32.xlu1 %v628_v23 }
 0x73b   :  { %v626_v24 = vpop.f32.mrf.mxu2 }
 0x73d   :  { %v873_v15 = vpop.f32.mrf.mxu1 }
 0x743   :  { %v725_v26 = vpop.f32.mrf.mxu2 }
 0x744   :  { %v729_v60 = vpack.c.bf16 %v725_v26, %v725_v26 }
 0x745   :  { %v875_v14 = vpop.f32.mrf.mxu1 }
 0x74b   :  { %v727_v45 = vpop.f32.mrf.mxu2 }
 0x758   :  { %v804_v27 = vpop.f32.mrf.mxu2 }
 0x759   :  { %v805_v20 = vadd.f32 %v804_v27, %v781_v17 }
 0x75b   :  { %v808_v28 = vsel %vm81_vm2, %v805_v20, -inf }
 0x75c   :  { %809 = vmax.xlane.f32.xlu2 %v808_v28 }
 0x760   :  { %v806_v1 = vpop.f32.mrf.mxu2 }
 0x768   :  { %v891_v30 = vpop.f32.mrf.mxu2 }
 0x769   :  { %v892_v31 = vadd.f32 %v891_v30, %v873_v15 }
 0x76b   :  { %v895_v32 = vsel %vm81_vm2, %v892_v31, -inf }
 0x76c   :  { %896 = vmax.xlane.f32.xlu0 %v895_v32 }
 0x770   :  { %v893_v19 = vpop.f32.mrf.mxu2 }
 0x780   :  { %820 = vrot.lane.b32.xlu0 %v1373_v44, %s1162_s25 }
 0x799   :  { %v452_v33 = vpop.f32.mrf.mxu3 }
 0x79a   :  { %v456_v36 = vadd.f32 %v452_v33, %v354_v37 }
 0x7a1   :  { %v454_v34 = vpop.f32.mrf.mxu3 }
 0x7a9   :  { %v537_v40 = vpop.f32.mrf.mxu3 }
 0x7aa   :  { %v541_v29 = vadd.f32 %v537_v40, %v456_v36  ;;  %v630_v42 = vpop.xlane.xlu1 %629 }
 0x7ab   :  { %v631_v43 = vsub.f32 %v625_v22, %v630_v42 }
 0x7ac   :  { %542 = vst.msk [vmem:[#allocation7] sm:$0xff] %vm124_vm0, %v541_v29 }
 0x7ad   :  { %v632_v47 = vmul.f32 1.442695, %v631_v43 }
 0x7af   :  { %1051 = vpow2.f32 %v632_v47 }
 0x7b1   :  { %v539_v48 = vpop.f32.mrf.mxu3 }
 0x7b5   :  { %v1052_v49 = vpop.eup %1051 }
 0x7b6   :  { %v634_v50 = vsel %vm81_vm2, %v1052_v49, 0.0 }
 0x7b7   :  { %635 = vadd.xlane.f32.xlu1 %v634_v50 }
 0x7cf   :  { %v810_v44 = vpop.xlane.xlu2 %809 }
 0x7d0   :  { %v811_v51 = vsub.f32 %v805_v20, %v810_v44 }
 0x7d2   :  { %v812_v21 = vmul.f32 1.442695, %v811_v51 }
 0x7d4   :  { %1053 = vpow2.f32 %v812_v21 }
 0x7da   :  { %v1054_v52 = vpop.eup %1053 }
 0x7db   :  { %v814_v46 = vsel %vm81_vm2, %v1054_v52, 0.0 }
 0x7dc   :  { %815 = vadd.xlane.f32.xlu2 %v814_v46 }
 0x7df   :  { %v897_v25 = vpop.xlane.xlu0 %896 }
 0x7e0   :  { %v898_v53 = vsub.f32 %v892_v31, %v897_v25 }
 0x7e2   :  { %v899_v54 = vmul.f32 1.442695, %v898_v53 }
 0x7e4   :  { %1055 = vpow2.f32 %v899_v54 }
 0x7ea   :  { %v1056_v55 = vpop.eup %1055 }
 0x7eb   :  { %v901_v56 = vsel %vm81_vm2, %v1056_v55, 0.0 }
 0x7ec   :  { %902 = vadd.xlane.f32.xlu1 %v901_v56 }
 0x7f2   :  { %v821_v59 = vpop.permute.xlu0 %820 }
 0x7f3   :  { %v826_v35 = vsel %vm236_vm6, %v821_v59, 0 }
 0x82a   :  { %v636_v57 = vpop.xlane.xlu1 %635 }
 0x82b   :  { %1057 = vrcp.f32 %v636_v57 }
 0x831   :  { %v1058_v58 = vpop.eup %1057 }
 0x832   :  { %v638_v39 = vmul.f32 %v1058_v58, %v1052_v49 }
 0x834   :  { %v639_v41 = vpack.c.bf16 %v638_v39, %v638_v39 }
 0x836   :  { %991 = vmatmul.msk.bf16.vlgmr.msrb.gmra.mxu3 %vm81_vm2, %v639_v41 }
 0x837   :  { %835 = vmatpush.bf16.msrb.mxu3 %v826_v35 }
 0x846   :  { %995 = vmatmul.msk.bf16.vlgmr.msra.gmra.mxu3 %vm81_vm2, %v729_v60 }
 0x847   :  { %917 = vmatpush.bf16.msra.mxu3 %v826_v35 }
 0x84f   :  { %v816_v61 = vpop.xlane.xlu2 %815 }
 0x850   :  { %1059 = vrcp.f32 %v816_v61 }
 0x856   :  { %v1060_v62 = vpop.eup %1059 }
 0x857   :  { %v818_v63 = vmul.f32 %v1060_v62, %v1054_v52 }
 0x859   :  { %v819_v0 = vpack.c.bf16 %v818_v63, %v818_v63 }
 0x85b   :  { %999 = vmatmul.msk.bf16.vlgmr.msrb.gmra.mxu3 %vm81_vm2, %v819_v0 }
 0x85f   :  { %v903_v3 = vpop.xlane.xlu1 %902 }
 0x860   :  { %1061 = vrcp.f32 %v903_v3 }
 0x866   :  { %v1062_v2 = vpop.eup %1061 }
 0x867   :  { %v905_v38 = vmul.f32 %v1062_v2, %v1056_v55 }
 0x869   :  { %v906_v5 = vpack.c.bf16 %v905_v38, %v905_v38 }
 0x86b   :  { %1003 = vmatmul.msk.bf16.vlgmr.msra.gmra.mxu3 %vm81_vm2, %v906_v5 }
 0x8b9   :  { %v660_v6 = vpop.f32.mrf.mxu3 }
 0x8ba   :  { %v664_v7 = vpack.c.bf16 %v660_v6, %v660_v6 }
 0x8bc   :  { %996 = vmatmul.msk.bf16.vlgmr.msra.gmra.mxu0 %vm81_vm2, %v664_v7 }
 0x8bd   :  { %934 = vmatpush.bf16.msra.mxu0 %v1398_v8 }
 0x8c1   :  { %v662_v9 = vpop.f32.mrf.mxu3 }
 0x8c9   :  { %v742_v10 = vpop.f32.mrf.mxu3 }
 0x8d1   :  { %v744_v11 = vpop.f32.mrf.mxu3 }
 0x8de   :  { %v837_v12 = vpop.f32.mrf.mxu3 }
 0x8df   :  { %v841_v13 = vpack.c.bf16 %v837_v12, %v837_v12 }
 0x8e1   :  { %1000 = vmatmul.msk.bf16.vlgmr.msrb.gmra.mxu0 %vm81_vm2, %v841_v13 }
 0x8e6   :  { %v839_v16 = vpop.f32.mrf.mxu3 }
 0x8ee   :  { %v919_v17 = vpop.f32.mrf.mxu3 }
 0x8ef   :  { %v923_v18 = vpack.c.bf16 %v919_v17, %v919_v17 }
 0x8f1   :  { %1004 = vmatmul.msk.bf16.vlgmr.msra.gmra.mxu0 %vm81_vm2, %v923_v18 }
 0x8f6   :  { %v921_v22 = vpop.f32.mrf.mxu3 }
 0x939   :  { %v758_v4 = vpop.f32.mrf.mxu0 }
 0x93a   :  { %v759_v26 = vadd.f32 %v758_v4, %v742_v10 }
 0x941   :  { %v760_v23 = vpop.f32.mrf.mxu0 }
 0x95e   :  { %v854_v24 = vpop.f32.mrf.mxu0 }
 0x95f   :  { %v858_v8 = vadd.f32 %v854_v24, %v759_v26 }
 0x966   :  { %v856_v15 = vpop.f32.mrf.mxu0 }
 0x96e   :  { %v936_v14 = vpop.f32.mrf.mxu0 }
 0x96f   :  { %v940_v45 = vadd.f32 %v936_v14, %v858_v8 }
 0x971   :  { %942 = vst.msk [vmem:[#allocation7 + $0x8] sm:$0xff] %vm124_vm0, %v940_v45 }
 0x972   :  { %955 = dma.vmem_to_hbm [thread:$0]  %s948_s27, 256, %s950_s0, [#allocation4], %s1164_s30, %s1164_s30, %s1147_s4  }
 0x976   :  { %v938_v27 = vpop.f32.mrf.mxu0 }
 0x977   :  { %1139 = dma.done.wait [#allocation4], 256  }
 0x978   :  { %1140 = vsyncadd [#allocation4], 4294967040 }
 0x979   :  { %960 = vsyncpa [#allocation3], 1 }
 0x97a   :  { %961 = vsyncpa [#allocation6], 1 }
 0x97b   :  { %962 = vsyncpa [#allocation4], 1 }

</bundles_post_ra>
